<compile_context>
chip_gen: v7x
topology: tpu7x:2x2x1
jax: 0.10.0
libtpu: 0.0.40
codegen_flags: <defaults>
</compile_context>

<pallas_src>
import jax
import jax.numpy as jnp
from jax.experimental import pallas as pl
from jax.experimental.pallas import tpu as pltpu


# ----------------------------------------------------------------------------
# Pallas kernel: elementwise logits * (1/temp), scalar held in SMEM.
# ----------------------------------------------------------------------------
def _scale_kernel(inv_ref, x_ref, o_ref):
    inv_t = inv_ref[0]                                   # scalar from SMEM
    o_ref[...] = (x_ref[...] * inv_t).astype(o_ref.dtype)  # single VPU multiply


def _round_up(x, m):
    return ((x + m - 1) // m) * m


def _choose_tile_m(B, C, itemsize, target_block_bytes=6 << 20):
    """Pick a row-tile size: full-width slabs capped at ~6 MiB per block."""
    row_bytes = max(1, C * itemsize)
    tile_m = max(8, (target_block_bytes // row_bytes) // 8 * 8)
    if tile_m >= B:
        # Whole array fits in one slab (full-dim block is always layout-legal).
        tile_m = B
        # v7x megacore: for MiB-scale inputs keep >= 2 grid steps so both
        # TensorCores get work.  (Near-neutral on single-TC v5e/v6e.)
        if B * row_bytes > (4 << 20) and B >= 16:
            half = _round_up(pl.cdiv(B, 2), 8)
            if half < B:
                tile_m = half
    return int(tile_m)


def dynamic_temperature_scale_kernel(logits, temp_scalar, *, donate_logits=False):
    """Apply logits * (1/temp) via a row-slab-tiled Pallas TPU kernel."""
    B, C = logits.shape
    itemsize = jnp.dtype(logits.dtype).itemsize
    tile_m = _choose_tile_m(B, C, itemsize)
    grid_m = pl.cdiv(B, tile_m)

    # Exact scalar reciprocal computed once outside the kernel (cheap & exact
    # enough); do NOT use pl.reciprocal(approx=True) inside -- it would break
    # the tight tolerance vs. the reference divide.
    inv_temp = jnp.reshape(1.0 / temp_scalar.astype(jnp.float32), (1,))

    extra = {}
    if donate_logits:
        # Alias logits buffer with the output (halves HBM footprint).
        extra["input_output_aliases"] = {1: 0}

    return pl.pallas_call(
        _scale_kernel,
        out_shape=jax.ShapeDtypeStruct(logits.shape, logits.dtype),
        grid=(grid_m,),
        in_specs=[
            pl.BlockSpec(memory_space=pltpu.MemorySpace.SMEM),  # 1/temp scalar
            pl.BlockSpec((tile_m, C), lambda i: (i, 0)),        # full-width row slab
        ],
        out_specs=pl.BlockSpec((tile_m, C), lambda i: (i, 0)),
        compiler_params=pltpu.CompilerParams(
            dimension_semantics=("parallel",),
            vmem_limit_bytes=32 << 20,   # safe headroom on v5e (16 MiB default)
        ),
        **extra,
    )(inv_temp, logits)


# ----------------------------------------------------------------------------
# Parameter setup (deterministic, PyTorch-style uniform init) + tiny MLP glue.
# ----------------------------------------------------------------------------
def init_params(key, init_temp=1.0):
    k1, k2, k3, k4 = jax.random.split(key, 4)
    b1 = 1.0 / jnp.sqrt(2.0)   # Linear(2, 8) fan_in = 2
    b2 = 1.0 / jnp.sqrt(8.0)   # Linear(8, 1) fan_in = 8
    return {
        "log_temp": jnp.log(jnp.asarray(init_temp, jnp.float32)),
        "w1": jax.random.uniform(k1, (8, 2), jnp.float32, -b1, b1),
        "b1": jax.random.uniform(k2, (8,), jnp.float32, -b1, b1),
        "gamma": jnp.ones((8,), jnp.float32),
        "beta": jnp.zeros((8,), jnp.float32),
        "w2": jax.random.uniform(k3, (1, 8), jnp.float32, -b2, b2),
        "b2": jax.random.uniform(k4, (1,), jnp.float32, -b2, b2),
    }


def compute_temp(params, pos_ratio=None, score_variance=None):
    """Scalar temperature (matches the PyTorch module's temp computation)."""
    if pos_ratio is not None and score_variance is not None:
        stats = jnp.array([pos_ratio, score_variance], jnp.float32)   # (2,)
        h = params["w1"] @ stats + params["b1"]                        # (8,)
        mu = jnp.mean(h)
        var = jnp.var(h)                                               # population var, as torch LayerNorm
        h = (h - mu) / jnp.sqrt(var + 1e-5) * params["gamma"] + params["beta"]
        h = jax.nn.relu(h)
        y = params["w2"] @ h + params["b2"]                            # (1,)
        dynamic_temp = jax.nn.softplus(y)
        temp = jnp.exp(params["log_temp"]) * dynamic_temp              # (1,)
        temp = temp[0]
    else:
        temp = jnp.exp(params["log_temp"])
    return jnp.clip(temp, 0.1, 10.0)                                   # .clamp(min=0.1, max=10.0)


def dynamic_temperature_scale(params, logits, pos_ratio=None, score_variance=None):
    temp = compute_temp(params, pos_ratio, score_variance)
    return dynamic_temperature_scale_kernel(logits, temp)


# ----------------------------------------------------------------------------
# Demo / self-check
# ----------------------------------------------------------------------------
if __name__ == "__main__":
    key = jax.random.PRNGKey(0)
    k_param, k_logits, k_logits2 = jax.random.split(key, 3)

    params = init_params(k_param, init_temp=1.0)

    # Small logits tensor: (batch=16, classes=256).
    logits = jax.random.normal(k_logits, (16, 256), jnp.float32)
    pos_ratio = 0.3
    score_variance = 0.05

    # Path with dynamic stats.
    out = dynamic_temperature_scale(params, logits, pos_ratio, score_variance)
    out = jax.block_until_ready(out)
    temp_ref = compute_temp(params, pos_ratio, score_variance)
    ref = logits / temp_ref
    assert jnp.allclose(out, ref, atol=1e-6, rtol=1e-6), "mismatch (dynamic path)"

    # Path without stats (temp = exp(log_temp) clamped).
    out2 = dynamic_temperature_scale(params, logits)
    out2 = jax.block_until_ready(out2)
    ref2 = logits / compute_temp(params)
    assert jnp.allclose(out2, ref2, atol=1e-6, rtol=1e-6), "mismatch (static path)"

    # Non-tile-aligned small shape (exercises full-dim / masked-edge handling).
    logits3 = jax.random.normal(k_logits2, (10, 200), jnp.float32)
    out3 = dynamic_temperature_scale(params, logits3, pos_ratio, score_variance)
    out3 = jax.block_until_ready(out3)
    ref3 = logits3 / temp_ref
    assert jnp.allclose(out3, ref3, atol=1e-6, rtol=1e-6), "mismatch (ragged path)"

    print("KERNEL_OK")
</pallas_src>

<mosaic_0001>
module attributes {stable_mosaic.version = 11 : i64} {
  func.func @_scale_kernel(%arg0: i32, %arg1: memref<1xf32, #tpu.memory_space<smem>>, %arg2: memref<16x256xf32, #tpu.memory_space<vmem>>, %arg3: memref<16x256xf32, #tpu.memory_space<vmem>>) attributes {dimension_semantics = [#tpu.dimension_semantics<parallel>], iteration_bounds = array<i64: 1>, scalar_prefetch = 0 : i64, scratch_operands = 0 : i64, tpu.core_type = #tpu.core_type<tc>, window_params = [{transform_indices = @transform_0, window_bounds = array<i64: 1>}, {transform_indices = @transform_1, window_bounds = array<i64: 16, 256>}, {transform_indices = @transform_2, window_bounds = array<i64: 16, 256>}]} {
    %c0 = arith.constant 0 : index
    %0 = memref.load %arg1[%c0] : memref<1xf32, #tpu.memory_space<smem>>
    %c0_0 = arith.constant 0 : index
    %c0_1 = arith.constant 0 : index
    %1 = vector.load %arg2[%c0_0, %c0_1] : memref<16x256xf32, #tpu.memory_space<vmem>>, vector<16x256xf32>
    %2 = vector.broadcast %0 : f32 to vector<16x256xf32>
    %3 = arith.mulf %1, %2 : vector<16x256xf32>
    %c0_2 = arith.constant 0 : index
    %c0_3 = arith.constant 0 : index
    %4 = vector.load %arg3[%c0_2, %c0_3] : memref<16x256xf32, #tpu.memory_space<vmem>>, vector<16x256xf32>
    tpu.vector_store %arg3[%c0_2, %c0_3], %3 {strides = array<i32>} : memref<16x256xf32, #tpu.memory_space<vmem>>, vector<16x256xf32>,
    return
  }
  func.func @transform_0(%arg0: i32) -> i32 {
    %c0_i32 = arith.constant 0 : i32
    %c0_i32_0 = arith.constant 0 : i32
    return %c0_i32 : i32
  }
  func.func @transform_1(%arg0: i32) -> (i32, i32) {
    %c0_i32 = arith.constant 0 : i32
    %c0_i32_0 = arith.constant 0 : i32
    return %arg0, %c0_i32 : i32, i32
  }
  func.func @transform_2(%arg0: i32) -> (i32, i32) {
    %c0_i32 = arith.constant 0 : i32
    %c0_i32_0 = arith.constant 0 : i32
    return %arg0, %c0_i32 : i32, i32
  }
}

</mosaic_0001>

<bundles_post_ra>
// kernel: tpu_custom_call.1
= control target key start
LH: loop header
LB: loop body
LE: loop exit
PB: predicated region body
PF: predicated region fallthrough
CT: control target
= control target key end

     0   :  { %8 = vsyncpa [#allocation4], 0  ;;  %s162_s0 = inlined_call_operand.<no memory space> [shape: f32[1], index: 0, kind: input, shape index: {}]   ;;  %s163_s1 = inlined_call_operand.hbm [shape: f32[16,256], index: 1, kind: input, shape index: {}]   ;;  %s164_s2 = inlined_call_operand.hbm [shape: f32[16,256], index: 2, kind: output, shape index: {}]  }
   0x1   :  { %9 = vsyncpa [#allocation5], 0  ;;  %s110_s9 = smov [#allocation3]   ;;  %s62_s13 = scalar_lea.hbm %s163_s1, 512 }
   0x2   :  { %s17_s10 = sshll.u32 %s110_s9, 4  ;;  %p63_p0 = scmp.ne.s32.totalorder %s163_s1, %s62_s13  ;;  %s18_s10 = int_to_ptr.vmem [resolvable:$true] %s17_s10 }
   0x3   :  { %p66_p1 = scmp.lt.u32.totalorder %s62_s13, %s163_s1 }
   0x5   :  { %p68_p2 = pnand %p66_p1, %p63_p0 }
   0x7   :  { %71 = shalt.err (!%p68_p2)
}
   0x8   :  { %s72_s18 = scalar_lea.vmem %s18_s10, 512  ;;  %p77_p4 = scmp.lt.s32.totalorder %s18_s10, %s18_s10 }
   0x9   :  { %p73_p3 = scmp.ne.s32.totalorder %s18_s10, %s72_s18  ;;  %p78_p5 = scmp.lt.s32.totalorder %s72_s18, %s72_s18 }
   0xb   :  { %p79_p6 = por %p78_p5, %p77_p4 }
   0xd   :  { %p80_p7 = pnand %p79_p6, %p73_p3 }
   0xf   :  { %83 = shalt.err (!%p80_p7)
}
  0x10   :  { %s111_s19 = smov 256   ;;  %s112_s20 = smov 16  }
  0x11   :  { %23 = dma.hbm_to_vmem [thread:$0]  %s163_s1, 512, %s18_s10, [#allocation4], %s111_s19, %s111_s19, %s112_s20  }
  0x12   :  { %106 = dma.done.wait [#allocation4], 512  }
  0x13   :  { %107 = vsyncadd [#allocation4], 4294966784  ;;  %v32_v0 = vstv %s162_s0  ;;  %s113_s25 = smov [#allocation6]   ;;  %v28_v1 = vld [vmem:[#allocation3] sm:$0xff]  ;;  %v29_v2 = vld [vmem:[#allocation3 + $0x8] sm:$0xff] }
  0x14   :  { %s46_s26 = sshll.u32 %s113_s25, 4  ;;  %v30_v3 = vld [vmem:[#allocation3 + $0x10] sm:$0xff]  ;;  %v33_v4 = vmul.f32 %v32_v0, %v28_v1  ;;  %v34_v5 = vmul.f32 %v32_v0, %v29_v2  ;;  %v31_v7 = vld [vmem:[#allocation3 + $0x18] sm:$0xff]  ;;  %s47_s26 = int_to_ptr.vmem [resolvable:$true] %s46_s26 }
  0x15   :  { %v35_v6 = vmul.f32 %v32_v0, %v30_v3  ;;  %v36_v8 = vmul.f32 %v32_v0, %v31_v7  ;;  %s84_s1 = scalar_lea.vmem %s47_s26, 512  ;;  %p89_p9 = scmp.lt.s32.totalorder %s47_s26, %s47_s26 }
  0x16   :  { %37 = vst [vmem:[#allocation6] sm:$0xff] %v33_v4  ;;  %38 = vst [vmem:[#allocation6 + $0x8] sm:$0xff] %v34_v5  ;;  %p85_p8 = scmp.ne.s32.totalorder %s47_s26, %s84_s1  ;;  %p90_p10 = scmp.lt.s32.totalorder %s84_s1, %s84_s1 }
  0x17   :  { %39 = vst [vmem:[#allocation6 + $0x10] sm:$0xff] %v35_v6  ;;  %40 = vst [vmem:[#allocation6 + $0x18] sm:$0xff] %v36_v8 }
  0x18   :  { %p91_p11 = por %p90_p10, %p89_p9 }
  0x1a   :  { %p92_p12 = pnand %p91_p11, %p85_p8 }
  0x1c   :  { %95 = shalt.err (!%p92_p12)
}
  0x1d   :  { %s96_s28 = scalar_lea.hbm %s164_s2, 512 }
  0x1e   :  { %p97_p13 = scmp.ne.s32.totalorder %s164_s2, %s96_s28  ;;  %p100_p0 = scmp.lt.u32.totalorder %s96_s28, %s164_s2 }
  0x20   :  { %p102_p1 = pnand %p100_p0, %p97_p13 }
  0x22   :  { %105 = shalt.err (!%p102_p1)
}
  0x23   :  { %52 = dma.vmem_to_hbm [thread:$0]  %s47_s26, 512, %s164_s2, [#allocation5], %s111_s19, %s111_s19, %s112_s20  }
  0x24   :  { %108 = dma.done.wait [#allocation5], 512  }
  0x25   :  { %109 = vsyncadd [#allocation5], 4294966784 }
  0x26   :  { %56 = vsyncpa [#allocation4], 1 }
  0x27   :  { %57 = vsyncpa [#allocation5], 1 }

</bundles_post_ra>
